<compile_context>
chip_gen: v7x
topology: tpu7x:2x2x1
jax: 0.10.0
libtpu: 0.0.40
codegen_flags: <defaults>
</compile_context>

<pallas_src>
import functools

import jax
import jax.numpy as jnp
from jax import lax
from jax.experimental import pallas as pl
from jax.experimental.pallas import tpu as pltpu

EPS = 1e-5
K1_MAX = 2048                     # largest K handled as a single reduction tile
VMEM_LIMIT = 48 * 1024 * 1024     # safe on v5e/v6e (128 MiB) and v7x (64 MiB)


# ------------------------------ tiling helpers ------------------------------
def _pick_tile(dim, target, mult):
    """Largest tile <= target that divides `dim` and is a multiple of `mult`.
    Falls back to the full dim (always a legal block size)."""
    if dim <= target:
        return dim
    for t in range(min(target, dim), mult - 1, -1):
        if dim % t == 0 and t % mult == 0:
            return t
    return dim


def _split_for_megacore(dim, tile, other_blocks):
    """If the parallel part of the grid would collapse to a single program,
    halve the row tile so v7x's second TensorCore has work."""
    if other_blocks * (dim // tile) >= 2:
        return tile
    half = tile // 2
    if tile % 2 == 0 and half > 0 and half % 8 == 0 and dim % half == 0:
        return half
    return tile


# --------------------------- in-kernel math helpers ---------------------------
def _gelu_exact(x):
    # erf via Abramowitz & Stegun 7.1.26 (|err| <= 1.5e-7). The 1/(1+p|u|)
    # divide is done with the EUP approx reciprocal so the GEGLU epilogue
    # does not spend VPU slots on divides.
    a1, a2, a3, a4, a5 = (0.254829592, -0.284496736, 1.421413741,
                          -1.453152027, 1.061405429)
    p = 0.3275911
    u = x * 0.7071067811865476
    sign = jnp.sign(u)
    au = jnp.abs(u)
    t = pl.reciprocal(1.0 + p * au, approx=True)
    poly = ((((a5 * t + a4) * t + a3) * t + a2) * t + a1) * t
    erf = sign * (1.0 - poly * jnp.exp(-au * au))
    return 0.5 * x * (1.0 + erf)


def _layernorm_f32(x, g_ref, b_ref):
    xf = x.astype(jnp.float32)
    mean = jnp.mean(xf, axis=-1, keepdims=True)
    xc = xf - mean
    var = jnp.mean(xc * xc, axis=-1, keepdims=True)            # two-pass variance
    return (xc * lax.rsqrt(var + EPS)) * g_ref[...].astype(jnp.float32) \
        + b_ref[...].astype(jnp.float32)


# ----------- fused (optional LN) multi-output projection: x @ [w0,w1,...] -----------
def _multi_proj_kernel(*refs, n_out, has_ln):
    idx = 0
    x_ref = refs[idx]; idx += 1
    if has_ln:
        g_ref, b_ref = refs[idx], refs[idx + 1]
        idx += 2
    w_refs = refs[idx: idx + n_out]; idx += n_out
    o_refs = refs[idx: idx + n_out]

    if has_ln:
        xn = _layernorm_f32(x_ref[...], g_ref, b_ref)
    else:
        xn = x_ref[...].astype(jnp.float32)
    for w_ref, o_ref in zip(w_refs, o_refs):
        o_ref[...] = jnp.dot(xn, w_ref[...],
                             preferred_element_type=jnp.float32).astype(o_ref.dtype)


def multi_proj(x, weights, gamma=None, beta=None, *, tm=256, tn=512):
    """out_i = (LN(x) if gamma else x) @ weights[i]; x is read from HBM once."""
    m, k = x.shape
    n = weights[0].shape[1]
    assert k <= K1_MAX, "LN/multi-output fusion requires K in a single tile"
    has_ln = gamma is not None
    tm = _pick_tile(m, tm, 8)
    tn = _pick_tile(n, tn, 128)
    tm = _split_for_megacore(m, tm, n // tn)

    in_specs = [pl.BlockSpec((tm, k), lambda i, j: (i, 0))]
    args = [x]
    if has_ln:
        in_specs += [pl.BlockSpec((1, k), lambda i, j: (0, 0)),
                     pl.BlockSpec((1, k), lambda i, j: (0, 0))]
        args += [gamma, beta]
    for w in weights:
        in_specs.append(pl.BlockSpec((k, tn), lambda i, j: (0, j)))
        args.append(w)

    outs = pl.pallas_call(
        functools.partial(_multi_proj_kernel, n_out=len(weights), has_ln=has_ln),
        grid=(m // tm, n // tn),
        in_specs=in_specs,
        out_specs=[pl.BlockSpec((tm, tn), lambda i, j: (i, j)) for _ in weights],
        out_shape=[jax.ShapeDtypeStruct((m, n), x.dtype) for _ in weights],
        compiler_params=pltpu.CompilerParams(
            dimension_semantics=("parallel", "parallel"),
            vmem_limit_bytes=VMEM_LIMIT),
    )(*args)
    return outs


# ------------------- plain linear (+ fused bias / residual) -------------------
def _linear_k1_kernel(*refs, has_bias, has_res):
    idx = 0
    x_ref = refs[idx]; idx += 1
    w_ref = refs[idx]; idx += 1
    bias_ref = refs[idx] if has_bias else None; idx += int(has_bias)
    res_ref = refs[idx] if has_res else None; idx += int(has_res)
    o_ref = refs[idx]
    out = jnp.dot(x_ref[...], w_ref[...], preferred_element_type=jnp.float32)
    if has_bias:
        out = out + bias_ref[...].astype(jnp.float32)
    if has_res:
        out = out + res_ref[...].astype(jnp.float32)
    o_ref[...] = out.astype(o_ref.dtype)


def _linear_acc_kernel(*refs, has_bias, has_res):
    idx = 0
    x_ref = refs[idx]; idx += 1
    w_ref = refs[idx]; idx += 1
    bias_ref = refs[idx] if has_bias else None; idx += int(has_bias)
    res_ref = refs[idx] if has_res else None; idx += int(has_res)
    o_ref, acc_ref = refs[idx], refs[idx + 1]

    @pl.when(pl.program_id(2) == 0)
    def _():
        acc_ref[...] = jnp.zeros_like(acc_ref)

    acc_ref[...] += jnp.dot(x_ref[...], w_ref[...],
                            preferred_element_type=jnp.float32)

    @pl.when(pl.program_id(2) == pl.num_programs(2) - 1)
    def _():
        out = acc_ref[...]
        if has_bias:
            out = out + bias_ref[...].astype(jnp.float32)
        if has_res:
            out = out + res_ref[...].astype(jnp.float32)
        o_ref[...] = out.astype(o_ref.dtype)


def linear(x, w, bias=None, residual=None, *, tm=256, tn=512, tk=1024):
    m, k = x.shape
    _, n = w.shape
    has_bias = bias is not None
    has_res = residual is not None
    tm = _pick_tile(m, tm, 8)
    tn = _pick_tile(n, tn, 128)

    if k <= K1_MAX:
        # Fast path: no K reduction grid, no accumulator scratch.
        tm = _split_for_megacore(m, tm, n // tn)
        in_specs = [pl.BlockSpec((tm, k), lambda i, j: (i, 0)),
                    pl.BlockSpec((k, tn), lambda i, j: (0, j))]
        args = [x, w]
        if has_bias:
            in_specs.append(pl.BlockSpec((1, tn), lambda i, j: (0, j)))
            args.append(bias)
        if has_res:
            in_specs.append(pl.BlockSpec((tm, tn), lambda i, j: (i, j)))
            args.append(residual)
        return pl.pallas_call(
            functools.partial(_linear_k1_kernel, has_bias=has_bias, has_res=has_res),
            grid=(m // tm, n // tn),
            in_specs=in_specs,
            out_specs=pl.BlockSpec((tm, tn), lambda i, j: (i, j)),
            out_shape=jax.ShapeDtypeStruct((m, n), x.dtype),
            compiler_params=pltpu.CompilerParams(
                dimension_semantics=("parallel", "parallel"),
                vmem_limit_bytes=VMEM_LIMIT),
        )(*args)

    # Large-K path: K-tiled reduction with f32 VMEM accumulator.
    tk = _pick_tile(k, tk, 128)
    in_specs = [pl.BlockSpec((tm, tk), lambda i, j, kk: (i, kk)),
                pl.BlockSpec((tk, tn), lambda i, j, kk: (kk, j))]
    args = [x, w]
    if has_bias:
        in_specs.append(pl.BlockSpec((1, tn), lambda i, j, kk: (0, j)))
        args.append(bias)
    if has_res:
        in_specs.append(pl.BlockSpec((tm, tn), lambda i, j, kk: (i, j)))
        args.append(residual)
    return pl.pallas_call(
        functools.partial(_linear_acc_kernel, has_bias=has_bias, has_res=has_res),
        grid=(m // tm, n // tn, k // tk),
        in_specs=in_specs,
        out_specs=pl.BlockSpec((tm, tn), lambda i, j, kk: (i, j)),
        out_shape=jax.ShapeDtypeStruct((m, n), x.dtype),
        scratch_shapes=[pltpu.VMEM((tm, tn), jnp.float32)],
        compiler_params=pltpu.CompilerParams(
            dimension_semantics=("parallel", "parallel", "arbitrary"),
            vmem_limit_bytes=VMEM_LIMIT),
    )(*args)


# ------------------- fused LN + GEGLU: x1 * gelu(x2) in-epilogue -------------------
def _geglu_ln_kernel(x_ref, g_ref, b_ref, w1_ref, w2_ref, b1_ref, b2_ref, o_ref):
    xn = _layernorm_f32(x_ref[...], g_ref, b_ref)
    a = jnp.dot(xn, w1_ref[...], preferred_element_type=jnp.float32) \
        + b1_ref[...].astype(jnp.float32)
    g = jnp.dot(xn, w2_ref[...], preferred_element_type=jnp.float32) \
        + b2_ref[...].astype(jnp.float32)
    o_ref[...] = (a * _gelu_exact(g)).astype(o_ref.dtype)


def geglu_ln(x, gamma, beta, w1, w2, b1, b2, *, tm=256, tn=512):
    m, k = x.shape
    _, n = w1.shape
    assert k <= K1_MAX
    tm = _pick_tile(m, tm, 8)
    tn = _pick_tile(n, tn, 128)
    tm = _split_for_megacore(m, tm, n // tn)
    return pl.pallas_call(
        _geglu_ln_kernel,
        grid=(m // tm, n // tn),
        in_specs=[
            pl.BlockSpec((tm, k), lambda i, j: (i, 0)),
            pl.BlockSpec((1, k), lambda i, j: (0, 0)),
            pl.BlockSpec((1, k), lambda i, j: (0, 0)),
            pl.BlockSpec((k, tn), lambda i, j: (0, j)),
            pl.BlockSpec((k, tn), lambda i, j: (0, j)),
            pl.BlockSpec((1, tn), lambda i, j: (0, j)),
            pl.BlockSpec((1, tn), lambda i, j: (0, j)),
        ],
        out_specs=pl.BlockSpec((tm, tn), lambda i, j: (i, j)),
        out_shape=jax.ShapeDtypeStruct((m, n), x.dtype),
        compiler_params=pltpu.CompilerParams(
            dimension_semantics=("parallel", "parallel"),
            vmem_limit_bytes=VMEM_LIMIT),
    )(x, gamma, beta, w1, w2, b1, b2)


# ------------- flash attention (online softmax, heads unrolled in-kernel) -------------
def _flash_heads_kernel(q_ref, k_ref, v_ref, o_ref, m_sc, l_sc, acc_sc, *,
                        num_heads, head_dim):
    kv = pl.program_id(2)

    @pl.when(kv == 0)
    def _():
        m_sc[...] = jnp.full_like(m_sc, -jnp.inf)
        l_sc[...] = jnp.zeros_like(l_sc)
        acc_sc[...] = jnp.zeros_like(acc_sc)

    q_all = q_ref[...]          # (tq,  C)  q already scaled by head_dim**-0.5
    k_all = k_ref[...]          # (tkv, C)
    v_all = v_ref[...]          # (tkv, C)

    for h in range(num_heads):  # static unroll; all column offsets static
        c0 = h * head_dim
        qh = q_all[:, c0:c0 + head_dim]
        kh = k_all[:, c0:c0 + head_dim]
        vh = v_all[:, c0:c0 + head_dim]
        s = lax.dot_general(qh, kh, (((1,), (1,)), ((), ())),
                            preferred_element_type=jnp.float32)      # (tq, tkv)
        m_prev = m_sc[h]
        m_new = jnp.maximum(m_prev, jnp.max(s, axis=-1, keepdims=True))
        alpha = jnp.exp(m_prev - m_new)
        p = jnp.exp(s - m_new)
        l_sc[h] = alpha * l_sc[h] + jnp.sum(p, axis=-1, keepdims=True)
        acc_sc[h] = alpha * acc_sc[h] + jnp.dot(
            p.astype(vh.dtype), vh, preferred_element_type=jnp.float32)
        m_sc[h] = m_new

    @pl.when(kv == pl.num_programs(2) - 1)
    def _():
        for h in range(num_heads):
            c0 = h * head_dim
            inv = pl.reciprocal(l_sc[h], approx=True)                # EUP slot
            o_ref[:, c0:c0 + head_dim] = (acc_sc[h] * inv).astype(o_ref.dtype)


def flash_attention(q, k, v, *, batch, q_len, kv_len, channels, num_heads,
                    tq=256, tkv=512):
    """q: (batch*q_len, channels), k/v: (batch*kv_len, channels); heads live in
    contiguous `head_dim` column slices — no head-split/merge transposes."""
    head_dim = channels // num_heads
    tq = _pick_tile(q_len, tq, 8)
    tkv = _pick_tile(kv_len, tkv, 8)
    # TODO(synk): kv_len not divisible by 8 with batch > 1 (e.g. CLIP's 77)
    # needs a padding/masking path; not exercised by this test config.
    q_blocks = q_len // tq
    kv_blocks = kv_len // tkv

    return pl.pallas_call(
        functools.partial(_flash_heads_kernel, num_heads=num_heads,
                          head_dim=head_dim),
        grid=(batch, q_blocks, kv_blocks),
        in_specs=[
            pl.BlockSpec((tq, channels), lambda b, qi, ki: (b * q_blocks + qi, 0)),
            pl.BlockSpec((tkv, channels), lambda b, qi, ki: (b * kv_blocks + ki, 0)),
            pl.BlockSpec((tkv, channels), lambda b, qi, ki: (b * kv_blocks + ki, 0)),
        ],
        out_specs=pl.BlockSpec((tq, channels), lambda b, qi, ki: (b * q_blocks + qi, 0)),
        out_shape=jax.ShapeDtypeStruct((batch * q_len, channels), q.dtype),
        scratch_shapes=[pltpu.VMEM((num_heads, tq, 1), jnp.float32),
                        pltpu.VMEM((num_heads, tq, 1), jnp.float32),
                        pltpu.VMEM((num_heads, tq, head_dim), jnp.float32)],
        compiler_params=pltpu.CompilerParams(
            dimension_semantics=("parallel", "parallel", "arbitrary"),
            vmem_limit_bytes=VMEM_LIMIT),
    )(q, k, v)


# ----------------------------- module forward -----------------------------
def basic_transformer_block_forward(x, encoder_hidden_states, kp, num_heads=8):
    b, t, c = x.shape
    x2 = x.reshape(b * t, c)

    # --- self attention: LN1 fused into one multi-output QKV projection ---
    q, k, v = multi_proj(x2, [kp["attn1_wq"], kp["attn1_wk"], kp["attn1_wv"]],
                         gamma=kp["ln1_g"], beta=kp["ln1_b"])
    attn = flash_attention(q, k, v, batch=b, q_len=t, kv_len=t,
                           channels=c, num_heads=num_heads)
    x2 = linear(attn, kp["attn1_wo"], kp["attn1_bo"], residual=x2)

    # --- cross attention: LN2 fused into the Q projection ---
    q = multi_proj(x2, [kp["attn2_wq"]], gamma=kp["ln2_g"], beta=kp["ln2_b"])[0]
    if encoder_hidden_states is not None:
        bk, tk, ck = encoder_hidden_states.shape
        kv_src = encoder_hidden_states.reshape(bk * tk, ck)
        k, v = multi_proj(kv_src, [kp["attn2_wk"], kp["attn2_wv"]])
        kv_len = tk
    else:
        # Matches torch fallback (only valid when cross_attention_dim == hidden).
        k, v = multi_proj(x2, [kp["attn2_wk"], kp["attn2_wv"]],
                          gamma=kp["ln2_g"], beta=kp["ln2_b"])
        kv_len = t
    attn = flash_attention(q, k, v, batch=b, q_len=t, kv_len=kv_len,
                           channels=c, num_heads=num_heads)
    x2 = linear(attn, kp["attn2_wo"], kp["attn2_bo"], residual=x2)

    # --- feed forward: LN3 + GEGLU fused, residual fused into FF-out ---
    g = geglu_ln(x2, kp["ln3_g"], kp["ln3_b"],
                 kp["ff_w1"], kp["ff_w2"], kp["ff_b1"], kp["ff_b2"])
    x2 = linear(g, kp["ff_wo"], kp["ff_bo"], residual=x2)
    return x2.reshape(b, t, c)


# ---------------------- parameters (reference layout + kernel layout) ----------------------
def _nrm(k, shape, s=0.02):
    return (s * jax.random.normal(k, shape)).astype(jnp.float32)


def init_attention_params(key, dim, cross_dim):
    ks = jax.random.split(key, 5)
    return {
        "wq": _nrm(ks[0], (dim, dim), 0.05),
        "wk": _nrm(ks[1], (cross_dim, dim), 0.05),
        "wv": _nrm(ks[2], (cross_dim, dim), 0.05),
        "wo": _nrm(ks[3], (dim, dim), 0.05),
        "bo": _nrm(ks[4], (dim,), 0.02),
    }


def init_block_params(key, dim, cross_dim):
    ks = jax.random.split(key, 12)
    return {
        "ln1_g": 1.0 + _nrm(ks[0], (dim,)),
        "ln1_b": _nrm(ks[1], (dim,)),
        "attn1": init_attention_params(ks[2], dim, dim),
        "ln2_g": 1.0 + _nrm(ks[3], (dim,)),
        "ln2_b": _nrm(ks[4], (dim,)),
        "attn2": init_attention_params(ks[5], dim, cross_dim),
        "ln3_g": 1.0 + _nrm(ks[6], (dim,)),
        "ln3_b": _nrm(ks[7], (dim,)),
        "ff_wp": _nrm(ks[8], (dim, 8 * dim), 0.05),   # GEGLU proj: H -> 8H
        "ff_bp": _nrm(ks[9], (8 * dim,), 0.02),
        "ff_w2": _nrm(ks[10], (4 * dim, dim), 0.05),  # FF out: 4H -> H
        "ff_b2": _nrm(ks[11], (dim,), 0.02),
    }


def prepare_kernel_params(p, hidden, num_heads):
    """One-time weight re-layout: fold the attention scale into w_q, pre-split
    the GEGLU projection, and pre-shape biases/LN params for the kernels."""
    hd = hidden // num_heads
    scale = hd ** -0.5
    c4 = 4 * hidden
    return {
        "ln1_g": p["ln1_g"].reshape(1, hidden), "ln1_b": p["ln1_b"].reshape(1, hidden),
        "attn1_wq": p["attn1"]["wq"] * scale,
        "attn1_wk": p["attn1"]["wk"], "attn1_wv": p["attn1"]["wv"],
        "attn1_wo": p["attn1"]["wo"], "attn1_bo": p["attn1"]["bo"].reshape(1, hidden),
        "ln2_g": p["ln2_g"].reshape(1, hidden), "ln2_b": p["ln2_b"].reshape(1, hidden),
        "attn2_wq": p["attn2"]["wq"] * scale,
        "attn2_wk": p["attn2"]["wk"], "attn2_wv": p["attn2"]["wv"],
        "attn2_wo": p["attn2"]["wo"], "attn2_bo": p["attn2"]["bo"].reshape(1, hidden),
        "ln3_g": p["ln3_g"].reshape(1, hidden), "ln3_b": p["ln3_b"].reshape(1, hidden),
        "ff_w1": p["ff_wp"][:, :c4], "ff_w2": p["ff_wp"][:, c4:],
        "ff_b1": p["ff_bp"][:c4].reshape(1, c4), "ff_b2": p["ff_bp"][c4:].reshape(1, c4),
        "ff_wo": p["ff_w2"], "ff_bo": p["ff_b2"].reshape(1, hidden),
    }


# ------------------- pure-JAX reference (mirrors PyTorch module) -------------------
def _ref_layernorm(x, g, b):
    mean = x.mean(-1, keepdims=True)
    var = ((x - mean) ** 2).mean(-1, keepdims=True)
    return (x - mean) / jnp.sqrt(var + EPS) * g + b


def _ref_attention(x, enc, p, num_heads):
    q = x @ p["wq"]
    src = x if enc is None else enc
    k = src @ p["wk"]
    v = src @ p["wv"]
    b, t, c = q.shape
    hd = c // num_heads

    def sp(y):
        bb, ss, _ = y.shape
        return y.reshape(bb, ss, num_heads, hd).transpose(0, 2, 1, 3)

    qh, kh, vh = sp(q), sp(k), sp(v)
    scores = jnp.einsum("bhqd,bhkd->bhqk", qh, kh) * (hd ** -0.5)
    w = jax.nn.softmax(scores, axis=-1)
    o = jnp.einsum("bhqk,bhkd->bhqd", w, vh)
    o = o.transpose(0, 2, 1, 3).reshape(b, t, c)
    return o @ p["wo"] + p["bo"]


def _ref_block(x, enc, p, num_heads):
    r = x
    h = _ref_layernorm(x, p["ln1_g"], p["ln1_b"])
    x = _ref_attention(h, None, p["attn1"], num_heads) + r
    r = x
    h = _ref_layernorm(x, p["ln2_g"], p["ln2_b"])
    x = _ref_attention(h, enc, p["attn2"], num_heads) + r
    r = x
    h = _ref_layernorm(x, p["ln3_g"], p["ln3_b"])
    proj = h @ p["ff_wp"] + p["ff_bp"]
    a, g = jnp.split(proj, 2, axis=-1)
    ff = a * jax.nn.gelu(g, approximate=False)
    return ff @ p["ff_w2"] + p["ff_b2"] + r


if __name__ == "__main__":
    B, T, HIDDEN = 2, 32, 64          # 8 heads x head_dim 8 (small test config)
    ENC_T, ENC_DIM = 16, 768          # cross_attention_dim fixed at 768 in the module
    NUM_HEADS = 8

    key = jax.random.PRNGKey(0)
    kparam, kx, ke = jax.random.split(key, 3)
    params = init_block_params(kparam, HIDDEN, ENC_DIM)
    kernel_params = prepare_kernel_params(params, HIDDEN, NUM_HEADS)
    x = jax.random.normal(kx, (B, T, HIDDEN), jnp.float32)
    enc = jax.random.normal(ke, (B, ENC_T, ENC_DIM), jnp.float32)

    out = jax.block_until_ready(
        basic_transformer_block_forward(x, enc, kernel_params, NUM_HEADS))
    ref = jax.block_until_ready(_ref_block(x, enc, params, NUM_HEADS))

    assert out.shape == (B, T, HIDDEN), out.shape
    err = float(jnp.max(jnp.abs(out - ref)))
    # Error budget: everything is f32; the only approximations are the EUP
    # reciprocals (~2^-12 rel err) in the softmax epilogue and erf polynomial,
    # which contribute well under 1e-3 absolute at these magnitudes.
    if err > 3e-3:
        raise AssertionError(f"mismatch vs pure-JAX reference: max abs err {err}")
    print("KERNEL_OK")
</pallas_src>

<mosaic_0001>
module attributes {stable_mosaic.version = 11 : i64} {
  func.func @_multi_proj_kernel(%arg0: i32, %arg1: i32, %arg2: memref<32x64xf32, #tpu.memory_space<vmem>>, %arg3: memref<1x64xf32, #tpu.memory_space<vmem>>, %arg4: memref<1x64xf32, #tpu.memory_space<vmem>>, %arg5: memref<64x64xf32, #tpu.memory_space<vmem>>, %arg6: memref<64x64xf32, #tpu.memory_space<vmem>>, %arg7: memref<64x64xf32, #tpu.memory_space<vmem>>, %arg8: memref<32x64xf32, #tpu.memory_space<vmem>>, %arg9: memref<32x64xf32, #tpu.memory_space<vmem>>, %arg10: memref<32x64xf32, #tpu.memory_space<vmem>>) attributes {dimension_semantics = [#tpu.dimension_semantics<parallel>, #tpu.dimension_semantics<parallel>], iteration_bounds = array<i64: 2, 1>, scalar_prefetch = 0 : i64, scratch_operands = 0 : i64, tpu.core_type = #tpu.core_type<tc>, window_params = [{transform_indices = @transform_0, window_bounds = array<i64: 32, 64>}, {pipeline_mode = #tpu.pipeline_mode<synchronous>, transform_indices = @transform_1, window_bounds = array<i64: 1, 64>}, {pipeline_mode = #tpu.pipeline_mode<synchronous>, transform_indices = @transform_2, window_bounds = array<i64: 1, 64>}, {transform_indices = @transform_3, window_bounds = array<i64: 64, 64>}, {transform_indices = @transform_4, window_bounds = array<i64: 64, 64>}, {transform_indices = @transform_5, window_bounds = array<i64: 64, 64>}, {transform_indices = @transform_6, window_bounds = array<i64: 32, 64>}, {transform_indices = @transform_7, window_bounds = array<i64: 32, 64>}, {transform_indices = @transform_8, window_bounds = array<i64: 32, 64>}]} {
    %c0 = arith.constant 0 : index
    %c0_0 = arith.constant 0 : index
    %0 = vector.load %arg2[%c0, %c0_0] : memref<32x64xf32, #tpu.memory_space<vmem>>, vector<32x64xf32>
    %cst = arith.constant dense<0.000000e+00> : vector<32xf32>
    %1 = vector.multi_reduction <add>, %0, %cst [1] : vector<32x64xf32> to vector<32xf32>
    %2 = vector.shape_cast %1 : vector<32xf32> to vector<32x1xf32>
    %cst_1 = arith.constant 6.400000e+01 : f32
    %3 = vector.broadcast %cst_1 : f32 to vector<32x1xf32>
    %4 = arith.divf %2, %3 : vector<32x1xf32>
    %5 = vector.broadcast %4 : vector<32x1xf32> to vector<32x64xf32>
    %6 = arith.subf %0, %5 : vector<32x64xf32>
    %7 = arith.mulf %6, %6 : vector<32x64xf32>
    %cst_2 = arith.constant dense<0.000000e+00> : vector<32xf32>
    %8 = vector.multi_reduction <add>, %7, %cst_2 [1] : vector<32x64xf32> to vector<32xf32>
    %9 = vector.shape_cast %8 : vector<32xf32> to vector<32x1xf32>
    %cst_3 = arith.constant 6.400000e+01 : f32
    %10 = vector.broadcast %cst_3 : f32 to vector<32x1xf32>
    %11 = arith.divf %9, %10 : vector<32x1xf32>
    %cst_4 = arith.constant 9.99999974E-6 : f32
    %12 = vector.broadcast %cst_4 : f32 to vector<32x1xf32>
    %13 = arith.addf %11, %12 : vector<32x1xf32>
    %14 = math.rsqrt %13 : vector<32x1xf32>
    %15 = vector.broadcast %14 : vector<32x1xf32> to vector<32x64xf32>
    %16 = arith.mulf %6, %15 : vector<32x64xf32>
    %c0_5 = arith.constant 0 : index
    %c0_6 = arith.constant 0 : index
    %17 = vector.load %arg3[%c0_5, %c0_6] : memref<1x64xf32, #tpu.memory_space<vmem>>, vector<1x64xf32>
    %18 = vector.broadcast %17 : vector<1x64xf32> to vector<32x64xf32>
    %19 = arith.mulf %16, %18 : vector<32x64xf32>
    %c0_7 = arith.constant 0 : index
    %c0_8 = arith.constant 0 : index
    %20 = vector.load %arg4[%c0_7, %c0_8] : memref<1x64xf32, #tpu.memory_space<vmem>>, vector<1x64xf32>
    %21 = vector.broadcast %20 : vector<1x64xf32> to vector<32x64xf32>
    %22 = arith.addf %19, %21 : vector<32x64xf32>
    %c0_9 = arith.constant 0 : index
    %c0_10 = arith.constant 0 : index
    %23 = vector.load %arg5[%c0_9, %c0_10] : memref<64x64xf32, #tpu.memory_space<vmem>>, vector<64x64xf32>
    %cst_11 = arith.constant dense<0.000000e+00> : vector<32x64xf32>
    %24 = tpu.matmul %22, %23, %cst_11 {dimension_numbers = #tpu.dot_dimension_numbers<[1], [0], [0], [1], [0, 0, 1, 1], [], []>} : vector<32x64xf32>, vector<64x64xf32>, vector<32x64xf32> -> vector<32x64xf32>
    %c0_12 = arith.constant 0 : index
    %c0_13 = arith.constant 0 : index
    %25 = vector.load %arg8[%c0_12, %c0_13] : memref<32x64xf32, #tpu.memory_space<vmem>>, vector<32x64xf32>
    tpu.vector_store %arg8[%c0_12, %c0_13], %24 {strides = array<i32>} : memref<32x64xf32, #tpu.memory_space<vmem>>, vector<32x64xf32>,
    %c0_14 = arith.constant 0 : index
    %c0_15 = arith.constant 0 : index
    %26 = vector.load %arg6[%c0_14, %c0_15] : memref<64x64xf32, #tpu.memory_space<vmem>>, vector<64x64xf32>
    %cst_16 = arith.constant dense<0.000000e+00> : vector<32x64xf32>
    %27 = tpu.matmul %22, %26, %cst_16 {dimension_numbers = #tpu.dot_dimension_numbers<[1], [0], [0], [1], [0, 0, 1, 1], [], []>} : vector<32x64xf32>, vector<64x64xf32>, vector<32x64xf32> -> vector<32x64xf32>
    %c0_17 = arith.constant 0 : index
    %c0_18 = arith.constant 0 : index
    %28 = vector.load %arg9[%c0_17, %c0_18] : memref<32x64xf32, #tpu.memory_space<vmem>>, vector<32x64xf32>
    tpu.vector_store %arg9[%c0_17, %c0_18], %27 {strides = array<i32>} : memref<32x64xf32, #tpu.memory_space<vmem>>, vector<32x64xf32>,
    %c0_19 = arith.constant 0 : index
    %c0_20 = arith.constant 0 : index
    %29 = vector.load %arg7[%c0_19, %c0_20] : memref<64x64xf32, #tpu.memory_space<vmem>>, vector<64x64xf32>
    %cst_21 = arith.constant dense<0.000000e+00> : vector<32x64xf32>
    %30 = tpu.matmul %22, %29, %cst_21 {dimension_numbers = #tpu.dot_dimension_numbers<[1], [0], [0], [1], [0, 0, 1, 1], [], []>} : vector<32x64xf32>, vector<64x64xf32>, vector<32x64xf32> -> vector<32x64xf32>
    %c0_22 = arith.constant 0 : index
    %c0_23 = arith.constant 0 : index
    %31 = vector.load %arg10[%c0_22, %c0_23] : memref<32x64xf32, #tpu.memory_space<vmem>>, vector<32x64xf32>
    tpu.vector_store %arg10[%c0_22, %c0_23], %30 {strides = array<i32>} : memref<32x64xf32, #tpu.memory_space<vmem>>, vector<32x64xf32>,
    return
  }
  func.func @transform_0(%arg0: i32, %arg1: i32) -> (i32, i32) {
    %c0_i32 = arith.constant 0 : i32
    %c0_i32_0 = arith.constant 0 : i32
    return %arg0, %c0_i32 : i32, i32
  }
  func.func @transform_1(%arg0: i32, %arg1: i32) -> (i32, i32) {
    %c0_i32 = arith.constant 0 : i32
    %c0_i32_0 = arith.constant 0 : i32
    %c0_i32_1 = arith.constant 0 : i32
    return %c0_i32, %c0_i32_0 : i32, i32
  }
  func.func @transform_2(%arg0: i32, %arg1: i32) -> (i32, i32) {
    %c0_i32 = arith.constant 0 : i32
    %c0_i32_0 = arith.constant 0 : i32
    %c0_i32_1 = arith.constant 0 : i32
    return %c0_i32, %c0_i32_0 : i32, i32
  }
  func.func @transform_3(%arg0: i32, %arg1: i32) -> (i32, i32) {
    %c0_i32 = arith.constant 0 : i32
    %c0_i32_0 = arith.constant 0 : i32
    return %c0_i32, %arg1 : i32, i32
  }
  func.func @transform_4(%arg0: i32, %arg1: i32) -> (i32, i32) {
    %c0_i32 = arith.constant 0 : i32
    %c0_i32_0 = arith.constant 0 : i32
    return %c0_i32, %arg1 : i32, i32
  }
  func.func @transform_5(%arg0: i32, %arg1: i32) -> (i32, i32) {
    %c0_i32 = arith.constant 0 : i32
    %c0_i32_0 = arith.constant 0 : i32
    return %c0_i32, %arg1 : i32, i32
  }
  func.func @transform_6(%arg0: i32, %arg1: i32) -> (i32, i32) {
    %c0_i32 = arith.constant 0 : i32
    return %arg0, %arg1 : i32, i32
  }
  func.func @transform_7(%arg0: i32, %arg1: i32) -> (i32, i32) {
    %c0_i32 = arith.constant 0 : i32
    return %arg0, %arg1 : i32, i32
  }
  func.func @transform_8(%arg0: i32, %arg1: i32) -> (i32, i32) {
    %c0_i32 = arith.constant 0 : i32
    return %arg0, %arg1 : i32, i32
  }
}

</mosaic_0001>

<bundles_post_ra>
// kernel: tpu_custom_call.1
= control target key start
LH: loop header
LB: loop body
LE: loop exit
PB: predicated region body
PF: predicated region fallthrough
CT: control target
= control target key end

     0   :  { %s2127_s0 = inlined_call_operand.hbm [shape: f32[64,64], index: 0, kind: input, shape index: {}]   ;;  %s2128_s1 = inlined_call_operand.vmem [shape: f32[1,64], index: 1, kind: input, shape index: {}]   ;;  %s2129_s2 = inlined_call_operand.vmem [shape: f32[1,64], index: 2, kind: input, shape index: {}]   ;;  %s2130_s3 = inlined_call_operand.hbm [shape: f32[64,64], index: 3, kind: input, shape index: {}]   ;;  %s2131_s4 = inlined_call_operand.hbm [shape: f32[64,64], index: 4, kind: input, shape index: {}]   ;;  %s2132_s5 = inlined_call_operand.hbm [shape: f32[64,64], index: 5, kind: input, shape index: {}]   ;;  %s2133_s6 = inlined_call_operand.hbm [shape: f32[64,64], index: 6, kind: output, shape index: {0}]   ;;  %s2134_s7 = inlined_call_operand.hbm [shape: f32[64,64], index: 7, kind: output, shape index: {1}]   ;;  %s2135_s8 = inlined_call_operand.hbm [shape: f32[64,64], index: 8, kind: output, shape index: {2}]  }
   0x1   :  { %2144 = sst [smem:[#allocation21_spill]] %s2127_s0 }
   0x2   :  { %2145 = sst [smem:[#allocation22_spill]] %s2133_s6 }
   0x3   :  { %2146 = sst [smem:[#allocation23_spill]] %s2135_s8 }
   0x4   :  { %14 = vsyncpa [#allocation3], 0 }
   0x5   :  { %16 = vsyncpa [#allocation3 + $0x1], 0 }
   0x6   :  { %17 = vsyncpa [#allocation6], 0 }
   0x7   :  { %18 = vsyncpa [#allocation9], 0 }
   0x8   :  { %19 = vsyncpa [#allocation4], 0 }
   0x9   :  { %21 = vsyncpa [#allocation4 + $0x1], 0 }
   0xa   :  { %22 = vsyncpa [#allocation12], 0 }
   0xb   :  { %24 = vsyncpa [#allocation12 + $0x1], 0  ;;  %s1696_s27 = smov 0   ;;  %s1698_s28 = smov 0  }
   0xc   :  { %s1700_s29 = smov 0   ;;  %s1702_s30 = smov 0  }
   0xd   :  { %s1704_s9 = smov 0   ;;  %s1706_s10 = smov 0  }
   0xe LB: > { %2147 = sst [smem:[#allocation19_spill]] %s1618_s27  ;;  %s1727_s11 = sadd.s32 4294967295, %s1638_s10   ;;  %s1638_s10 = sphi %s1706_s10, %s30_s10   ;;  %s1634_s9 = sphi %s1704_s9, %s2175_s9   ;;  %s1630_s30 = sphi %s1702_s30, %s2174_s30   ;;  %s1626_s29 = sphi %s1700_s29, %s2173_s29   ;;  %s1622_s28 = sphi %s1698_s28, %s2172_s28   ;;  %s1618_s27 = sphi %s1696_s27, %s2171_s27  }
   0xf   : > { %s2136_s12 = sadd.s32 4294967294, %s1638_s10   ;;  %p62_p0 = scmp.ne.s32.totalorder %s1622_s28, %s1618_s27 }
  0x10   : > { %p2137_p1 = scmp.eq.s32.totalorder %s1727_s11, 0  ;;  %p214_p3 = scmp.eq.s32.totalorder %s2136_s12, 1 }
  0x11   : > { %p1056_p5 = scmp.ge.s32.totalorder %s1638_s10, 1  ;;  %p277_p7 = scmp.lt.s32.totalorder %s1638_s10, 3 }
  0x12   : > { %p1738_p4 = por %p2137_p1, %p62_p0  ;;  %p1743_p6 = por %p214_p3, %p62_p0 }
  0x13   : > { %p1748_p8 = pnand %p1056_p5, %p277_p7  ;;  %s1640_s16 = smov [#allocation5]  }
  0x14   : > { %s2148_s13 = scalar_select %p1738_p4, 1, 0 }
  0x15   : > { %s2149_s14 = scalar_select %p1743_p6, 1, 0 }
  0x16   : > { %s2151_s15 = scalar_select %p1748_p8, 1, 0 }
  0x17   : > { %2150 = sst [smem:[#allocation20_spill]] %s2149_s14  ;;  %s297_s17 = sshll.u32 %s1640_s16, 4  ;;  %s1752_s17 = int_to_ptr.vmem [resolvable:$true] %s297_s17 }
  0x18   : > { %p1279_p9 = pneg %p1748_p8  ;;  %s1641_s19 = smov [#allocation7]  }
  0x19   : > { %s312_s20 = sshll.u32 %s1641_s19, 4  ;;  %s1642_s21 = smov [#allocation8]   ;;  %s1763_s20 = int_to_ptr.vmem [resolvable:$true] %s312_s20 }
  0x1a   : > { %p1759_p11 = pnand %p1279_p9, %p2137_p1  ;;  %s1765_s22 = sshll.u32 %s1642_s21, 4  ;;  %s328_s22 = int_to_ptr.vmem [resolvable:$true] %s1765_s22 }
  0x1b   : > { %s1374_s25 = scalar_lea.hbm %s2130_s3, 1024 }
  0x1c   : > { %p1375_p12 = scmp.ne.s32.totalorder %s2130_s3, %s1374_s25  ;;  %p1775_p13 = pneg %p1759_p11 }
  0x1d   : > { %p1381_p5 = scmp.lt.u32.totalorder %s1374_s25, %s2130_s3 }
  0x1e   : > { %p1377_p0 = pnand %p1775_p13, %p1375_p12 }
  0x20   : > { %p1378_p3 = pneg %p1377_p0 }
  0x22   : > { %p1383_p7 = pnand %p1381_p5, %p1378_p3 }
  0x24   : > { %1386 = shalt.err (!%p1383_p7)
}
  0x25   : > { %s1387_s23 = scalar_lea.vmem %s1752_s17, 1024  ;;  %p1395_p2 = scmp.lt.s32.totalorder %s1752_s17, %s1752_s17 }
  0x26   : > { %p1388_p9 = scmp.ne.s32.totalorder %s1752_s17, %s1387_s23  ;;  %p1396_p6 = scmp.lt.s32.totalorder %s1387_s23, %s1387_s23 }
  0x28   : > { %p1390_p10 = pnand %p1388_p9, %p1775_p13  ;;  %p1397_p12 = por %p1396_p6, %p1395_p2 }
  0x2a   : > { %p1391_p1 = pneg %p1390_p10 }
  0x2c   : > { %p1398_p0 = pnand %p1397_p12, %p1391_p1 }
  0x2e   : > { %1401 = shalt.err (!%p1398_p0)
}
  0x2f   : > { %s1643_s24 = smov 128   ;;  %s1644_s25 = smov 8  }
  0x30   : > { %1282 = dma.hbm_to_vmem [thread:$0]  (!%p1759_p11), %s2130_s3, 1024, %s1752_s17, [#allocation6], %s1643_s24, %s1643_s24, %s1644_s25  }
  0x31   : > { %s1402_s23 = scalar_lea.hbm %s2131_s4, 1024 }
  0x32   : > { %p1403_p1 = scmp.ne.s32.totalorder %s2131_s4, %s1402_s23  ;;  %p1409_p10 = scmp.lt.u32.totalorder %s1402_s23, %s2131_s4 }
  0x34   : > { %p1405_p2 = pnand %p1403_p1, %p1775_p13 }
  0x36   : > { %p1406_p6 = pneg %p1405_p2 }
  0x38   : > { %p1411_p3 = pnand %p1409_p10, %p1406_p6 }
  0x3a   : > { %1414 = shalt.err (!%p1411_p3)
}
  0x3b   : > { %s1415_s17 = scalar_lea.vmem %s1763_s20, 1024  ;;  %p1423_p12 = scmp.lt.s32.totalorder %s1763_s20, %s1763_s20 }
  0x3c   : > { %p1416_p5 = scmp.ne.s32.totalorder %s1763_s20, %s1415_s17  ;;  %p1424_p0 = scmp.lt.s32.totalorder %s1415_s17, %s1415_s17 }
  0x3e   : > { %p1418_p7 = pnand %p1416_p5, %p1775_p13  ;;  %p1425_p1 = por %p1424_p0, %p1423_p12 }
  0x40   : > { %p1419_p9 = pneg %p1418_p7 }
  0x42   : > { %p1426_p2 = pnand %p1425_p1, %p1419_p9 }
  0x44   : > { %1429 = shalt.err (!%p1426_p2)
}
  0x45   : > { %1285 = dma.hbm_to_vmem [thread:$0]  (!%p1759_p11), %s2131_s4, 1024, %s1763_s20, [#allocation6], %s1643_s24, %s1643_s24, %s1644_s25  }
  0x46   : > { %s1430_s26 = scalar_lea.hbm %s2132_s5, 1024 }
  0x47   : > { %p1431_p6 = scmp.ne.s32.totalorder %s2132_s5, %s1430_s26  ;;  %p1437_p5 = scmp.lt.u32.totalorder %s1430_s26, %s2132_s5 }
  0x49   : > { %p1433_p10 = pnand %p1431_p6, %p1775_p13 }
  0x4b   : > { %p1434_p3 = pneg %p1433_p10 }
  0x4d   : > { %p1439_p7 = pnand %p1437_p5, %p1434_p3 }
  0x4f   : > { %1442 = shalt.err (!%p1439_p7)
}
  0x50   : > { %s1443_s17 = scalar_lea.vmem %s328_s22, 1024  ;;  %p1451_p1 = scmp.lt.s32.totalorder %s328_s22, %s328_s22 }
  0x51   : > { %p1444_p9 = scmp.ne.s32.totalorder %s328_s22, %s1443_s17  ;;  %p1452_p2 = scmp.lt.s32.totalorder %s1443_s17, %s1443_s17 }
  0x53   : > { %p1446_p12 = pnand %p1444_p9, %p1775_p13  ;;  %p1453_p4 = por %p1452_p2, %p1451_p1 }
  0x55   : > { %p1447_p0 = pneg %p1446_p12 }
  0x57   : > { %p1454_p8 = pnand %p1453_p4, %p1447_p0 }
  0x59   : > { %1457 = shalt.err (!%p1454_p8)
}
  0x5a   : > { %1288 = dma.hbm_to_vmem [thread:$0]  (!%p1759_p11), %s2132_s5, 1024, %s328_s22, [#allocation9], %s1643_s24, %s1643_s24, %s1644_s25  }
  0x5b   : > { %s49_s12 = sadd.s32 1, %s1626_s29  ;;  %s42_s18 = sadd.s32 1, %s1634_s9 }
  0x5c   : > { %p56_p4 = scmp.ne.s32.totalorder %s1626_s29, %s1622_s28  ;;  %p44_p8 = scmp.ge.s32.totalorder %s42_s18, 2 }
  0x5d   : > { %p57_p13 = scmp.eq.s32.totalorder %s1638_s10, 0  ;;  %p2154_p6 = scmp.eq.s32.totalorder %s1727_s11, 1 }
  0x5e   : > { %p1306_p3 = scmp.lt.s32.totalorder %s1638_s10, 2  ;;  %s2177_s18 = smov (%p44_p8, %s42_s18), 0 }
  0x5f   : > { %p1854_p10 = por %p2154_p6, %p56_p4  ;;  %p58_p5 = por %p57_p13, %p56_p4 }
  0x60   : > { %s341_s27 = sand.u32 1, %s1626_s29   ;;  %s46_s14 = ssub.s32 %s1634_s9, %s2177_s18 }
  0x61   : > { %p47_p7 = scmp.eq.s32.totalorder %s46_s14, 0  ;;  %s1061_s22 = sshll.u32 %s341_s27, 5 }
  0x62   : > { %s1097_s26 = sshll.u32 %s1634_s9, 9  ;;  %s2156_s0 = sld [smem:[#allocation21_spill]] }
  0x63   : > { %s1866_s16 = scalar_select %p47_p7, %s1626_s29, %s49_s12  }
  0x64   : > { %s345_s17 = scalar_lea.vmem [#allocation2], %s1061_s22  ;;  %p1877_p11 = pnand %p1306_p3, %p58_p5 }
  0x65   : > { %s352_s20 = sshll.u32 %s345_s17, 4  ;;  %s1881_s12 = scalar_lea.sflag [#allocation3], %s341_s27  ;;  %s1873_s20 = int_to_ptr.vmem [resolvable:$true] %s352_s20 }
  0x66   : > { %p1460_p12 = pneg %p1877_p11 }
  0x68   : > { %s1871_s23 = scalar_lea.hbm %s2156_s0, %s1097_s26  ;;  %s1463_s19 = scalar_lea.hbm %s2156_s0, 1024 }
  0x69   : > { %s1458_s14 = scalar_lea.hbm %s1871_s23, 512  ;;  %p1464_p2 = scmp.lt.u32.totalorder %s1871_s23, %s2156_s0 }
  0x6a   : > { %p1459_p9 = scmp.ne.s32.totalorder %s1871_s23, %s1458_s14  ;;  %p1465_p4 = scmp.lt.u32.totalorder %s1463_s19, %s1458_s14 }
  0x6b   : > { %p1467_p13 = scmp.lt.u32.totalorder %s1458_s14, %s1871_s23 }
  0x6c   : > { %p1461_p0 = pnand %p1460_p12, %p1459_p9  ;;  %p1466_p8 = por %p1465_p4, %p1464_p2 }
  0x6e   : > { %p1462_p1 = pneg %p1461_p0  ;;  %p1468_p6 = por %p1467_p13, %p1466_p8 }
  0x70   : > { %p1469_p3 = pnand %p1468_p6, %p1462_p1 }
  0x72   : > { %1472 = shalt.err (!%p1469_p3)
}
  0x73   : > { %s1473_s27 = scalar_lea.vmem %s1873_s20, 512  ;;  %s1645_s22 = smov [#allocation2]  }
  0x74   : > { %p1474_p5 = scmp.ne.s32.totalorder %s1873_s20, %s1473_s27  ;;  %s1478_s26 = sshll.u32 %s1645_s22, 4  ;;  %s1479_s26 = int_to_ptr.vmem [resolvable:$false] %s1478_s26 }
  0x75   : > { %s1480_s21 = scalar_lea.vmem %s1479_s26, 1024  ;;  %p1481_p0 = scmp.lt.s32.totalorder %s1873_s20, %s1479_s26 }
  0x76   : > { %p1476_p7 = pnand %p1474_p5, %p1460_p12  ;;  %p1482_p2 = scmp.lt.s32.totalorder %s1480_s21, %s1473_s27 }
  0x78   : > { %p1477_p9 = pneg %p1476_p7  ;;  %p1483_p4 = por %p1482_p2, %p1481_p0 }
  0x7a   : > { %p1484_p8 = pnand %p1483_p4, %p1477_p9 }
  0x7c   : > { %1487 = shalt.err (!%p1484_p8)
}
  0x7d   : > { %1292 = dma.hbm_to_vmem [thread:$0]  (!%p1877_p11), %s1871_s23, 512, %s1873_s20, %s1881_s12, %s1643_s24, %s1643_s24, %s1644_s25  }
  0x7e   : > { %p2158_p12 = scmp.ne.s32.totalorder %s2151_s15, 0 }
  0x7f   : > { %s1915_s14 = sand.u32 (!%p2158_p12), 1, %s1622_s28   ;;  %p2159_p1 = scmp.ne.s32.totalorder (!%p2158_p12), %s2148_s13, 0 }
  0x80   : > { %364 = sbr.rel (%p2158_p12) target bundleno = 741 (0x2e5), region = 44  ;;  %s1918_s19 = sshll.u32 (!%p2158_p12), %s1915_s14, 5 }
  0x81   : > { %s367_s6 = scalar_lea.sflag (!%p2158_p12), [#allocation3], %s1915_s14  ;;  %s370_s17 = scalar_lea.vmem (!%p2158_p12), [#allocation2], %s1918_s19 }
  0x87   : > { %1597 = dma.done.wait (%p2159_p1), %s367_s6, 512  }
  0x88   : > { %1599 = vsyncadd (%p2159_p1), %s367_s6, 4294966784  ;;  %p2160_p11 = scmp.eq.s32.totalorder %s1727_s11, 0 }
  0x8a   : > { %1601 = dma.done.wait (%p2160_p11), [#allocation6], 2048   ;;  %p2161_p13 = pmov %p2160_p11 }
  0x8b   : > { %p2162_p6 = pmov %p2160_p11 }
  0x8c   : > { %1603 = vsyncadd (%p2161_p13), [#allocation6], 4294965248 }
  0x8d   : > { %1605 = dma.done.wait (%p2162_p6), [#allocation9], 1024   ;;  %p2163_p3 = pmov %p2162_p6 }
  0x8e   : > { %vm433_vm0 = vcmask 523264   ;;  %v429_v0 = vld [vmem:[%s370_s17] sm:$0xff]  ;;  %v431_v1 = vld [vmem:[%s370_s17 + $0x10] sm:$0xff]  ;;  %v430_v2 = vld [vmem:[%s370_s17 + $0x8] sm:$0xff]  ;;  %s410_s23 = scalar_lea.vmem [#allocation10], %s1918_s19  ;;  %s417_s12 = scalar_lea.vmem [#allocation11], %s1918_s19 }
  0x8f   : > { %1607 = vsyncadd (%p2163_p3), [#allocation9], 4294966272  ;;  %v434_v3 = vsel %vm433_vm0, %v429_v0, 0.0  ;;  %v440_v4 = vsel %vm433_vm0, %v431_v1, 0.0  ;;  %v432_v5 = vld [vmem:[%s370_s17 + $0x18] sm:$0xff]  ;;  %v437_v6 = vsel %vm433_vm0, %v430_v2, 0.0 }
  0x90   : > { %435 = vadd.xlane.f32.xlu0 %v434_v3  ;;  %441 = vadd.xlane.f32.xlu1 %v440_v4  ;;  %v443_v7 = vsel %vm433_vm0, %v432_v5, 0.0  ;;  %v509_v28 = vld [vmem:[#allocation5] sm:$0xff]  ;;  %v510_v29 = vld [vmem:[#allocation5 + $0x8] sm:$0xff]  ;;  %v511_v34 = vld [vmem:[#allocation5 + $0x10] sm:$0xff]  ;;  %s837_s20 = sshll.u32 %s410_s23, 4  ;;  %s854_s27 = sshll.u32 %s417_s12, 4  ;;  %s1988_s20 = int_to_ptr.vmem [resolvable:$true] %s837_s20  ;;  %s1990_s27 = int_to_ptr.vmem [resolvable:$true] %s854_s27 }
  0x91   : > { %v618_v30 = vld [vmem:[#allocation7] sm:$0xff]  ;;  %v1203_v31 = vpack.c.bf16 %v510_v29, %v509_v28  ;;  %v619_v32 = vld [vmem:[#allocation7 + $0x8] sm:$0xff]  ;;  %v512_v35 = vld [vmem:[#allocation5 + $0x18] sm:$0xff]  ;;  %s817_s22 = sand.u32 1, %s1727_s11   ;;  %s1986_s26 = sshll.u32 %s1630_s30, 9 }
  0x92   : > { %v1219_v33 = vpack.c.bf16 %v619_v32, %v618_v30  ;;  %v620_v36 = vld [vmem:[#allocation7 + $0x10] sm:$0xff]  ;;  %v1207_v37 = vpack.c.bf16 %v512_v35, %v511_v34  ;;  %v621_v38 = vld [vmem:[#allocation7 + $0x18] sm:$0xff]  ;;  %v513_v40 = vld [vmem:[#allocation5 + $0x20] sm:$0xff]  ;;  %s1998_s30 = scalar_lea.hbm %s2134_s7, %s1986_s26  ;;  %s2164_s13 = sld [smem:[#allocation22_spill]] }
  0x93   : > { %1204 = vmatprep.subr.bf16.mxu0 %v1203_v31  ;;  %v1223_v39 = vpack.c.bf16 %v621_v38, %v620_v36  ;;  %v514_v41 = vld [vmem:[#allocation5 + $0x28] sm:$0xff]  ;;  %v622_v42 = vld [vmem:[#allocation7 + $0x20] sm:$0xff]  ;;  %v515_v45 = vld [vmem:[#allocation5 + $0x30] sm:$0xff]  ;;  %s2010_s24 = scalar_lea.sflag [#allocation12], %s817_s22  ;;  %s1488_s25 = scalar_lea.vmem %s1990_s27, 512 }
  0x94   : > { %438 = vadd.xlane.f32.xlu0 %v437_v6  ;;  %444 = vadd.xlane.f32.xlu1 %v443_v7  ;;  %v1211_v43 = vpack.c.bf16 %v514_v41, %v513_v40  ;;  %v623_v44 = vld [vmem:[#allocation7 + $0x28] sm:$0xff]  ;;  %v516_v46 = vld [vmem:[#allocation5 + $0x38] sm:$0xff]  ;;  %v624_v48 = vld [vmem:[#allocation7 + $0x30] sm:$0xff]  ;;  %p1489_p5 = scmp.ne.s32.totalorder %s1990_s27, %s1488_s25  ;;  %s1646_s11 = smov [#allocation11]  }
  0x95   : > { %1220 = vmatprep.subr.bf16.mxu1 %v1219_v33  ;;  %1206 = vmatpush3.bf16.msra.mxu0 %v1203_v31  ;;  %v1227_v47 = vpack.c.bf16 %v623_v44, %v622_v42  ;;  %v625_v49 = vld [vmem:[#allocation7 + $0x38] sm:$0xff]  ;;  %v1215_v50 = vpack.c.bf16 %v516_v46, %v515_v45  ;;  %v715_v52 = vld [vmem:[#allocation8] sm:$0xff]  ;;  %v716_v53 = vld [vmem:[#allocation8 + $0x8] sm:$0xff]  ;;  %s1492_s21 = sshll.u32 %s1646_s11, 4  ;;  %s1493_s21 = int_to_ptr.vmem [resolvable:$false] %s1492_s21 }
  0x96   : > { %1222 = vmatpush3.bf16.msra.mxu1 %v1219_v33  ;;  %1208 = vmatprep.subr.bf16.mxu0 %v1207_v37  ;;  %v1231_v51 = vpack.c.bf16 %v625_v49, %v624_v48  ;;  %v1235_v54 = vpack.c.bf16 %v716_v53, %v715_v52  ;;  %v1072_v4 = vld [vmem:[%s2128_s1] ss:$0 sm:$0xff]  ;;  %v722_v28 = vld [vmem:[#allocation8 + $0x38] sm:$0xff]  ;;  %p1490_p7 = pnand %p1489_p5, %p1854_p10  ;;  %s1494_s0 = scalar_lea.vmem %s1493_s21, 1024 }
  0x97   : > { %1224 = vmatprep.subr.bf16.mxu1 %v1223_v39  ;;  %v1073_v6 = vld [vmem:[%s2129_s2] ss:$0 sm:$0xff]  ;;  %p1495_p0 = scmp.lt.s32.totalorder %s1990_s27, %s1493_s21  ;;  %p1496_p2 = scmp.lt.s32.totalorder %s1494_s0, %s1488_s25 }
  0x98   : > { %s2006_s15 = scalar_lea.hbm %s2164_s13, %s1986_s26  ;;  %p1491_p9 = pneg %p1490_p7 }
  0x99   : > { %1210 = vmatpush3.bf16.msra.mxu0 %v1207_v37  ;;  %p1497_p4 = por %p1496_p2, %p1495_p0 }
  0x9a   : > { %1226 = vmatpush3.bf16.msra.mxu1 %v1223_v39  ;;  %1212 = vmatprep.subr.bf16.mxu0 %v1211_v43 }
  0x9b   : > { %1228 = vmatprep.subr.bf16.mxu1 %v1227_v47  ;;  %p1498_p8 = pnand %p1497_p4, %p1491_p9 }
  0x9d   : > { %1214 = vmatpush3.bf16.msra.mxu0 %v1211_v43 }
  0x9e   : > { %1230 = vmatpush3.bf16.msra.mxu1 %v1227_v47  ;;  %1216 = vmatprep.subr.bf16.mxu0 %v1215_v50 }
  0x9f   : > { %1232 = vmatprep.subr.bf16.mxu1 %v1231_v51 }
  0xa1   : > { %1218 = vmatpush3.bf16.msra.mxu0 %v1215_v50 }
  0xa2   : > { %1234 = vmatpush3.bf16.msra.mxu1 %v1231_v51  ;;  %1236 = vmatprep.subr.bf16.mxu0 %v1235_v54 }
  0xa3   : > { %1251 = vmatprep.subr.bf16.mxu1 %v1235_v54 }
 0x11d   : > { %v436_v8 = vpop.xlane.xlu0 %435  ;;  %v442_v9 = vpop.xlane.xlu1 %441 }
 0x11e   : > { %v447_v10 = vmul.f32 0.015625, %v436_v8  ;;  %v449_v11 = vmul.f32 0.015625, %v442_v9 }
 0x120   : > { %v1938_v12 = vsub.f32 %v429_v0, %v447_v10  ;;  %v1940_v13 = vsub.f32 %v431_v1, %v449_v11 }
 0x121   : > { %v439_v14 = vpop.xlane.xlu0 %438  ;;  %v445_v15 = vpop.xlane.xlu1 %444 }
 0x122   : > { %v448_v16 = vmul.f32 0.015625, %v439_v14  ;;  %v450_v17 = vmul.f32 0.015625, %v445_v15  ;;  %v455_v18 = vmul.f32 %v1938_v12, %v1938_v12  ;;  %v457_v19 = vmul.f32 %v1940_v13, %v1940_v13 }
 0x124   : > { %v1946_v20 = vsub.f32 %v430_v2, %v448_v16  ;;  %v1948_v21 = vsub.f32 %v432_v5, %v450_v17  ;;  %v459_v22 = vsel %vm433_vm0, %v455_v18, 0.0  ;;  %v465_v23 = vsel %vm433_vm0, %v457_v19, 0.0  ;;  %v717_v16 = vld [vmem:[#allocation8 + $0x10] sm:$0xff]  ;;  %v718_v17 = vld [vmem:[#allocation8 + $0x18] sm:$0xff] }
 0x125   : > { %460 = vadd.xlane.f32.xlu0 %v459_v22 }
 0x126   : > { %v456_v24 = vmul.f32 %v1946_v20, %v1946_v20  ;;  %v458_v25 = vmul.f32 %v1948_v21, %v1948_v21 }
 0x128   : > { %v462_v26 = vsel %vm433_vm0, %v456_v24, 0.0  ;;  %v468_v27 = vsel %vm433_vm0, %v458_v25, 0.0  ;;  %v1239_v24 = vpack.c.bf16 %v718_v17, %v717_v16  ;;  %v720_v25 = vld [vmem:[#allocation8 + $0x28] sm:$0xff] }
 0x129   : > { %466 = vadd.xlane.f32.xlu0 %v465_v23  ;;  %463 = vadd.xlane.f32.xlu1 %v462_v26 }
 0x12d   : > { %469 = vadd.xlane.f32.xlu1 %v468_v27 }
 0x1b2   : > { %v461_v55 = vpop.xlane.xlu0 %460 }
 0x1b3   : > { %v471_v56 = vmul.f32 0.015625, %v461_v55 }
 0x1b5   : > { %v475_v57 = vadd.f32 1e-05, %v471_v56 }
 0x1b6   : > { %v464_v58 = vpop.xlane.xlu1 %463  ;;  %v467_v59 = vpop.xlane.xlu0 %466 }
 0x1b7   : > { %1366 = vrsqrt.f32 %v475_v57  ;;  %v472_v60 = vmul.f32 0.015625, %v464_v58  ;;  %v473_v61 = vmul.f32 0.015625, %v467_v59 }
 0x1b9   : > { %v476_v62 = vadd.f32 1e-05, %v472_v60  ;;  %v477_v63 = vadd.f32 1e-05, %v473_v61 }
 0x1ba   : > { %v470_v0 = vpop.xlane.xlu1 %469 }
 0x1bb   : > { %1368 = vrsqrt.f32 %v476_v62  ;;  %v474_v1 = vmul.f32 0.015625, %v470_v0 }
 0x1bc   : > { %1370 = vrsqrt.f32 %v477_v63 }
 0x1bd   : > { %v478_v2 = vadd.f32 1e-05, %v474_v1 }
 0x1bf   : > { %1372 = vrsqrt.f32 %v478_v2 }
 0x1c1   : > { %v1367_v3 = vpop.eup %1366 }
 0x1c2   : > { %v483_v5 = vmul.f32 %v1367_v3, %v1938_v12 }
 0x1c4   : > { %v494_v7 = vmul.f32 %v1072_v4, %v483_v5 }
 0x1c5   : > { %v1369_v8 = vpop.eup %1368 }
 0x1c6   : > { %v1371_v9 = vpop.eup %1370  ;;  %v505_v10 = vadd.f32 %v1073_v6, %v494_v7  ;;  %v484_v11 = vmul.f32 %v1369_v8, %v1946_v20 }
 0x1c7   : > { %v485_v14 = vmul.f32 %v1371_v9, %v1940_v13  ;;  %v719_v13 = vld [vmem:[#allocation8 + $0x20] sm:$0xff] }
 0x1c8   : > { %1153 = vmatprep.mubr.msk.f32.mxu0 %vm433_vm0, %v505_v10  ;;  %1175 = vmatprep.mubr.msk.f32.mxu1 %vm433_vm0, %v505_v10  ;;  %v495_v15 = vmul.f32 %v1072_v4, %v484_v11  ;;  %v1243_v27 = vpack.c.bf16 %v720_v25, %v719_v13 }
 0x1c9   : > { %v1373_v12 = vpop.eup %1372  ;;  %v496_v18 = vmul.f32 %v1072_v4, %v485_v14 }
 0x1ca   : > { %v506_v19 = vadd.f32 %v1073_v6, %v495_v15  ;;  %v486_v22 = vmul.f32 %v1373_v12, %v1948_v21  ;;  %v721_v21 = vld [vmem:[#allocation8 + $0x30] sm:$0xff] }
 0x1cb   : > { %v507_v23 = vadd.f32 %v1073_v6, %v496_v18  ;;  %v1247_v29 = vpack.c.bf16 %v722_v28, %v721_v21 }
 0x1cc   : > { %1154 = vmatmul.mubr.msk.f32.vlgmr.msra.gmra.mrb[0].mxu0 %vm433_vm0, %v506_v19  ;;  %1176 = vmatmul.mubr.msk.f32.vlgmr.msra.gmra.mrb[0].mxu1 %vm433_vm0, %v506_v19  ;;  %v497_v20 = vmul.f32 %v1072_v4, %v486_v22 }
 0x1cd   : > { %1238 = vmatpush3.bf16.msra.mxu0 %v1235_v54  ;;  %1255 = vmatpush3.bf16.msra.mxu1 %v1235_v54 }
 0x1ce   : > { %1156 = vmatprep.mubr.msk.f32.mxu0 %vm433_vm0, %v507_v23  ;;  %1178 = vmatprep.mubr.msk.f32.mxu1 %vm433_vm0, %v507_v23  ;;  %v508_v26 = vadd.f32 %v1073_v6, %v497_v20 }
 0x1cf   : > { %1240 = vmatprep.subr.bf16.mxu0 %v1239_v24  ;;  %1252 = vmatprep.subr.bf16.mxu1 %v1239_v24 }
 0x1d0   : > { %1157 = vmatmul.mubr.msk.f32.gmra.mrb[2].mxu0 %vm433_vm0, %v508_v26  ;;  %1179 = vmatmul.mubr.msk.f32.gmra.mrb[2].mxu1 %vm433_vm0, %v508_v26 }
 0x1d1   : > { %1242 = vmatpush3.bf16.msra.mxu0 %v1239_v24  ;;  %1256 = vmatpush3.bf16.msra.mxu1 %v1239_v24 }
 0x1d2   : > { %1197 = vmatprep.mubr.msk.f32.mxu0 %vm433_vm0, %v505_v10  ;;  %1200 = vmatprep.mubr.msk.f32.mxu1 %vm433_vm0, %v507_v23 }
 0x1d3   : > { %1244 = vmatprep.subr.bf16.mxu0 %v1243_v27  ;;  %1253 = vmatprep.subr.bf16.mxu1 %v1243_v27 }
 0x1d5   : > { %1246 = vmatpush3.bf16.msra.mxu0 %v1243_v27  ;;  %1257 = vmatpush3.bf16.msra.mxu1 %v1243_v27 }
 0x1d6   : > { %1248 = vmatprep.subr.bf16.mxu0 %v1247_v29  ;;  %1254 = vmatprep.subr.bf16.mxu1 %v1247_v29 }
 0x1d9   : > { %1250 = vmatpush3.bf16.msra.mxu0 %v1247_v29  ;;  %1258 = vmatpush3.bf16.msra.mxu1 %v1247_v29 }
 0x1dc   : > { %1198 = vmatmul.mubr.msk.f32.vlgmr.msra.gmra.mrb[4].mxu0 %vm433_vm0, %v506_v19  ;;  %1201 = vmatmul.mubr.msk.f32.vlgmr.msra.gmra.mrb[4].mxu1 %vm433_vm0, %v508_v26 }
 0x29f   : > { %v1155_v30 = vpop.f32.mrb[0].mxu0  ;;  %v1177_v31 = vpop.f32.mrb[0].mxu1 }
 0x2a0   : > { %615 = vst.msk [vmem:[%s410_s23 + $0x8] sm:$0xff] %vm433_vm0, %v1155_v30  ;;  %712 = vst.msk [vmem:[%s417_s12 + $0x8] sm:$0xff] %vm433_vm0, %v1177_v31  ;;  %v595_v32 = vpop.f32.mrb[1].mxu0  ;;  %v692_v33 = vpop.f32.mrb[1].mxu1 }
 0x2a1   : > { %614 = vst.msk [vmem:[%s410_s23] sm:$0xff] %vm433_vm0, %v595_v32  ;;  %711 = vst.msk [vmem:[%s417_s12] sm:$0xff] %vm433_vm0, %v692_v33 }
 0x2a3   : > { %v1158_v34 = vpop.f32.mrb[2].mxu0  ;;  %v1180_v35 = vpop.f32.mrb[2].mxu1 }
 0x2a4   : > { %617 = vst.msk [vmem:[%s410_s23 + $0x18] sm:$0xff] %vm433_vm0, %v1158_v34  ;;  %714 = vst.msk [vmem:[%s417_s12 + $0x18] sm:$0xff] %vm433_vm0, %v1180_v35  ;;  %v605_v36 = vpop.f32.mrb[3].mxu0  ;;  %v702_v37 = vpop.f32.mrb[3].mxu1 }
 0x2a5   : > { %616 = vst.msk [vmem:[%s410_s23 + $0x10] sm:$0xff] %vm433_vm0, %v605_v36  ;;  %713 = vst.msk [vmem:[%s417_s12 + $0x10] sm:$0xff] %vm433_vm0, %v702_v37 }
 0x2a6   : > { %1501 = shalt.err (!%p1498_p8)
}
 0x2a7   : > { %s1502_s23 = scalar_lea.hbm %s1998_s30, 512  ;;  %s1506_s6 = scalar_lea.hbm %s2134_s7, 1024 }
 0x2a8   : > { %p1503_p12 = scmp.ne.s32.totalorder %s1998_s30, %s1502_s23  ;;  %p1507_p13 = scmp.lt.u32.totalorder %s1998_s30, %s2134_s7 }
 0x2a9   : > { %p1508_p6 = scmp.lt.u32.totalorder %s1506_s6, %s1502_s23  ;;  %p1510_p5 = scmp.lt.u32.totalorder %s1502_s23, %s1998_s30 }
 0x2aa   : > { %p1504_p1 = pnand %p1503_p12, %p1854_p10 }
 0x2ab   : > { %p1509_p3 = por %p1508_p6, %p1507_p13 }
 0x2ac   : > { %p1505_p11 = pneg %p1504_p1 }
 0x2ad   : > { %p1511_p7 = por %p1510_p5, %p1509_p3 }
 0x2af   : > { %p1512_p9 = pnand %p1511_p7, %p1505_p11 }
 0x2b1   : > { %1515 = shalt.err (!%p1512_p9)
}
 0x2b2   : > { %s1647_s0 = smov 128   ;;  %s1648_s25 = smov 8  }
 0x2b3   : > { %1274 = dma.vmem_to_hbm [thread:$0]  (%p1854_p10), %s1990_s27, 512, %s1998_s30, %s2010_s24, %s1647_s0, %s1647_s0, %s1648_s25  }
 0x2b4   : > { %s813_s21 = scalar_lea.sflag [#allocation4], %s1915_s14  ;;  %s1516_s23 = scalar_lea.vmem %s1988_s20, 512 }
 0x2b5   : > { %p1517_p0 = scmp.ne.s32.totalorder %s1988_s20, %s1516_s23  ;;  %s1649_s12 = smov [#allocation10]  }
 0x2b6   : > { %s1520_s22 = sshll.u32 %s1649_s12, 4  ;;  %s1521_s22 = int_to_ptr.vmem [resolvable:$false] %s1520_s22 }
 0x2b7   : > { %p1518_p2 = pnand %p1517_p0, %p1854_p10  ;;  %s1522_s6 = scalar_lea.vmem %s1521_s22, 1024 }
 0x2b8   : > { %p1523_p8 = scmp.lt.s32.totalorder %s1988_s20, %s1521_s22  ;;  %p1524_p12 = scmp.lt.s32.totalorder %s1522_s6, %s1516_s23 }
 0x2b9   : > { %p1519_p4 = pneg %p1518_p2 }
 0x2ba   : > { %p1525_p1 = por %p1524_p12, %p1523_p8 }
 0x2bc   : > { %p1526_p11 = pnand %p1525_p1, %p1519_p4 }
 0x2be   : > { %1529 = shalt.err (!%p1526_p11)
}
 0x2bf   : > { %s1530_s27 = scalar_lea.hbm %s2006_s15, 512  ;;  %s1534_s11 = scalar_lea.hbm %s2164_s13, 1024 }
 0x2c0   : > { %p1531_p13 = scmp.ne.s32.totalorder %s2006_s15, %s1530_s27  ;;  %p1535_p5 = scmp.lt.u32.totalorder %s2006_s15, %s2164_s13 }
 0x2c1   : > { %p1536_p7 = scmp.lt.u32.totalorder %s1534_s11, %s1530_s27  ;;  %p1538_p0 = scmp.lt.u32.totalorder %s1530_s27, %s2006_s15 }
 0x2c2   : > { %p1532_p6 = pnand %p1531_p13, %p1854_p10 }
 0x2c3   : > { %p1537_p9 = por %p1536_p7, %p1535_p5 }
 0x2c4   : > { %p1533_p3 = pneg %p1532_p6 }
 0x2c5   : > { %p1539_p2 = por %p1538_p0, %p1537_p9 }
 0x2c7   : > { %p1540_p4 = pnand %p1539_p2, %p1533_p3 }
 0x2c9   : > { %1543 = shalt.err (!%p1540_p4)
}
 0x2ca   : > { %1273 = dma.vmem_to_hbm [thread:$0]  (%p1854_p10), %s1988_s20, 512, %s2006_s15, %s813_s21, %s1647_s0, %s1647_s0, %s1648_s25   ;;  %v1199_v38 = vpop.f32.mrb[4].mxu0  ;;  %v1202_v39 = vpop.f32.mrb[4].mxu1 }
 0x2cb   : > { %s424_s23 = scalar_lea.vmem [#allocation13], %s1918_s19  ;;  %s2165_s17 = sld [smem:[#allocation23_spill]]  ;;  %v789_v40 = vpop.f32.mrb[5].mxu0  ;;  %v799_v41 = vpop.f32.mrb[5].mxu1 }
 0x2cc   : > { %s871_s6 = sshll.u32 %s424_s23, 4  ;;  %809 = vst.msk [vmem:[%s424_s23 + $0x8] sm:$0xff] %vm433_vm0, %v1199_v38  ;;  %811 = vst.msk [vmem:[%s424_s23 + $0x18] sm:$0xff] %vm433_vm0, %v1202_v39  ;;  %s1650_s19 = smov [#allocation13]   ;;  %s2065_s6 = int_to_ptr.vmem [resolvable:$true] %s871_s6 }
 0x2cd   : > { %808 = vst.msk [vmem:[%s424_s23] sm:$0xff] %vm433_vm0, %v789_v40  ;;  %810 = vst.msk [vmem:[%s424_s23 + $0x10] sm:$0xff] %vm433_vm0, %v799_v41  ;;  %s1544_s14 = scalar_lea.vmem %s2065_s6, 512  ;;  %s1548_s20 = sshll.u32 %s1650_s19, 4  ;;  %s1549_s20 = int_to_ptr.vmem [resolvable:$false] %s1548_s20 }
 0x2ce   : > { %p1545_p8 = scmp.ne.s32.totalorder %s2065_s6, %s1544_s14  ;;  %p1551_p11 = scmp.lt.s32.totalorder %s2065_s6, %s1549_s20 }
 0x2d0   : > { %p1546_p12 = pnand %p1545_p8, %p1854_p10 }
 0x2d1   : > { %s2071_s11 = scalar_lea.hbm %s2165_s17, %s1986_s26  ;;  %s1550_s26 = scalar_lea.vmem %s1549_s20, 1024 }
 0x2d2   : > { %p1547_p1 = pneg %p1546_p12  ;;  %p1552_p13 = scmp.lt.s32.totalorder %s1550_s26, %s1544_s14 }
 0x2d4   : > { %p1553_p6 = por %p1552_p13, %p1551_p11 }
 0x2d6   : > { %p1554_p3 = pnand %p1553_p6, %p1547_p1 }
 0x2d8   : > { %1557 = shalt.err (!%p1554_p3)
}
 0x2d9   : > { %s1558_s15 = scalar_lea.hbm %s2071_s11, 512  ;;  %s1562_s22 = scalar_lea.hbm %s2165_s17, 1024 }
 0x2da   : > { %p1559_p5 = scmp.ne.s32.totalorder %s2071_s11, %s1558_s15  ;;  %p1563_p0 = scmp.lt.u32.totalorder %s2071_s11, %s2165_s17 }
 0x2db   : > { %p1564_p2 = scmp.lt.u32.totalorder %s1562_s22, %s1558_s15  ;;  %p1566_p8 = scmp.lt.u32.totalorder %s1558_s15, %s2071_s11 }
 0x2dc   : > { %p1560_p7 = pnand %p1559_p5, %p1854_p10 }
 0x2dd   : > { %p1565_p4 = por %p1564_p2, %p1563_p0 }
 0x2de   : > { %p1561_p9 = pneg %p1560_p7 }
 0x2df   : > { %p1567_p12 = por %p1566_p8, %p1565_p4 }
 0x2e1   : > { %p1568_p1 = pnand %p1567_p12, %p1561_p9 }
 0x2e3   : > { %1571 = shalt.err (!%p1568_p1)
}
 0x2e4   : > { %1275 = dma.vmem_to_hbm [thread:$0]  (%p1854_p10), %s2065_s6, 512, %s2071_s11, %s2010_s24, %s1647_s0, %s1647_s0, %s1648_s25  }
 0x2e5 PF: > { %s2166_s30 = sld [smem:[#allocation19_spill]]  ;;  %s2167_s14 = sld [smem:[#allocation20_spill]] }
 0x2e6   : > { %p2169_p13 = scmp.ge.s32.totalorder %s1638_s10, 2 }
 0x2eb   : > { %s886_s19 = sand.u32 1, %s2166_s30   ;;  %p2168_p11 = scmp.ne.s32.totalorder %s2167_s14, 0 }
 0x2ec   : > { %s887_s20 = scalar_lea.sflag [#allocation4], %s886_s19 }
 0x2ed   : > { %p1294_p6 = pnand %p2169_p13, %p2168_p11 }
 0x2ef   : > { %1609 = dma.done.wait (!%p1294_p6), %s887_s20, 512  }
 0x2f0   : > { %1611 = vsyncadd (!%p1294_p6), %s887_s20, 4294966784  ;;  %s2170_s8 = sadd.s32 4294967294, %s1638_s10  }
 0x2f1   : > { %s895_s26 = sand.u32 1, %s2170_s8  }
 0x2f2   : > { %s896_s15 = scalar_lea.sflag [#allocation12], %s895_s26 }
 0x2f3   : > { %1613 = dma.done.wait (!%p1294_p6), %s896_s15, 1024  }
 0x2f4   : > { %1615 = vsyncadd (!%p1294_p6), %s896_s15, 4294966272  ;;  %s30_s10 = sadd.s32 1, %s1638_s10   ;;  %s2171_s27 = smov %s1622_s28 }
 0x2f5   : > { %p27_p10 = scmp.ge.s32.totalorder %s30_s10, 4   ;;  %s2172_s28 = smov %s1626_s29 }
 0x2f6   : > { %s2173_s29 = smov %s1866_s16  ;;  %s2174_s30 = smov %s1634_s9 }
 0x2f7   : > { %s2175_s9 = smov %s2177_s18  ;;  %29 = sbr.rel (!%p27_p10) target bundleno = 14 (0xe), region = 136 }
 0x2fe   :  { %910 = vsyncpa [#allocation3], 1 }
 0x2ff   :  { %912 = vsyncpa [#allocation3 + $0x1], 1 }
 0x300   :  { %913 = vsyncpa [#allocation6], 1 }
 0x301   :  { %914 = vsyncpa [#allocation9], 1 }
 0x302   :  { %915 = vsyncpa [#allocation4], 1 }
 0x303   :  { %917 = vsyncpa [#allocation4 + $0x1], 1 }
 0x304   :  { %918 = vsyncpa [#allocation12], 1 }
 0x305   :  { %920 = vsyncpa [#allocation12 + $0x1], 1 }

</bundles_post_ra>
